<compile_context>
chip_gen: v7x
topology: tpu7x:2x2x1
jax: 0.10.0
libtpu: 0.0.40
codegen_flags: <defaults>
</compile_context>

<pallas_src>
import jax
import jax.numpy as jnp
from jax.experimental import pallas as pl
from jax.experimental.pallas import tpu as pltpu

LANES = 128
MAX_TM = 4096            # 4096 x 128 f32 = 2 MiB per block (8 MiB pipelined: safe on v5e/v6e/v7x)
MIN_PALLAS_ELEMS = 1024  # below this, plain JAX beats kernel-launch + padding overhead


def affine_kernel(coef_ref, x_ref, o_ref):
    # coef_ref: SMEM (2,) f32 = [scale, shift] — the collapsed affine chain.
    # x_ref / o_ref: (tm, 128) f32 lane-dense batch tiles.  Pure VPU FMA.
    s = coef_ref[0]            # read scalars once per grid step
    t = coef_ref[1]
    o_ref[...] = x_ref[...] * s + t


def _fold_affine(params):
    """Fold W1..W5 / b1..b5 of the activation-free chain into y = a*x + c (exact)."""
    w, b = params[0]
    a, c = w, b                      # a: (1, d), c: (1, d)
    for w, b in params[1:]:
        a = a @ w
        c = c @ w + b
    return jnp.concatenate([a.reshape(1), c.reshape(1)]).astype(jnp.float32)  # (2,)


def net_forward(x, params):
    """x: (N, 1) float32. params: list of (W, b) with W (in, out), b (1, out)."""
    coef = _fold_affine(params)

    x_flat = x.reshape(-1).astype(jnp.float32)   # (N,1)->(N,) is a free view
    N = x_flat.shape[0]

    # Tiny batch: skip the kernel entirely (launch/pad overhead > work).
    if N < MIN_PALLAS_ELEMS:
        return (x_flat * coef[0] + coef[1]).reshape(N, 1)

    # Lane-dense batch layout: batch lives on lanes.  Pad only up to the next
    # 128-lane row (and only if actually needed) — the ragged row tail is then
    # handled by Pallas' partial-block masking, NOT by padding up to a block.
    padded_n = pl.cdiv(N, LANES) * LANES
    xp = jnp.pad(x_flat, (0, padded_n - N)) if padded_n != N else x_flat
    rows = padded_n // LANES
    xp = xp.reshape(rows, LANES)

    # Grow the block as large as useful (cap 4096 sublanes = 2 MiB f32 block).
    tm = 8
    while tm < MAX_TM and tm * 2 <= rows:
        tm *= 2
    grid = pl.cdiv(rows, tm)   # last block may be partial; Pallas masks it

    out = pl.pallas_call(
        affine_kernel,
        out_shape=jax.ShapeDtypeStruct((rows, LANES), jnp.float32),
        grid=(grid,),
        in_specs=[
            pl.BlockSpec(memory_space=pltpu.MemorySpace.SMEM),  # packed [scale, shift]
            pl.BlockSpec((tm, LANES), lambda i: (i, 0)),        # x batch tile
        ],
        out_specs=pl.BlockSpec((tm, LANES), lambda i: (i, 0)),
        compiler_params=pltpu.CompilerParams(
            dimension_semantics=("parallel",)),                 # shards across v7x's 2 TCs
    )(coef, xp)

    out_flat = out.reshape(-1)          # contiguous, free
    if padded_n != N:
        out_flat = out_flat[:N]         # only copies when padding was added
    return out_flat.reshape(N, 1)


def init_params(key):
    """Deterministic init matching nn.Linear shapes: 1->4->8->16->8->1."""
    dims = [1, 4, 8, 16, 8, 1]
    params = []
    for i in range(len(dims) - 1):
        fan_in, fan_out = dims[i], dims[i + 1]
        key, kw, kb = jax.random.split(key, 3)
        bound = 1.0 / (fan_in ** 0.5)   # PyTorch default uniform(-1/sqrt(in), 1/sqrt(in))
        w = jax.random.uniform(kw, (fan_in, fan_out), jnp.float32, -bound, bound)
        b = jax.random.uniform(kb, (1, fan_out), jnp.float32, -bound, bound)
        params.append((w, b))
    return params


def reference_forward(x, params):
    # Layer-by-layer reference (mirrors the PyTorch module exactly).
    h = x
    for w, b in params:
        h = h @ w + b
    return h


if __name__ == "__main__":
    key = jax.random.PRNGKey(0)
    key, k1, k2, k3 = jax.random.split(key, 4)
    params = init_params(key)

    # Case 1: tiny batch, mirrors `x = torch.unsqueeze(x, dim=1)` — plain-JAX path.
    x_small = jnp.expand_dims(jax.random.normal(k1, (8,), jnp.float32), axis=1)
    out_small = jax.block_until_ready(net_forward(x_small, params))
    assert out_small.shape == (8, 1)
    assert jnp.allclose(out_small, reference_forward(x_small, params), atol=1e-5, rtol=1e-5)

    # Case 2: Pallas path, N a multiple of 128 (no pad, no post-slice copy).
    x_even = jnp.expand_dims(jax.random.normal(k2, (2048,), jnp.float32), axis=1)
    out_even = jax.block_until_ready(net_forward(x_even, params))
    assert out_even.shape == (2048, 1)
    assert jnp.allclose(out_even, reference_forward(x_even, params), atol=1e-5, rtol=1e-5)

    # Case 3: Pallas path with ragged N (pad to 128-row + partial last grid block).
    x_ragged = jnp.expand_dims(jax.random.normal(k3, (1234,), jnp.float32), axis=1)
    out_ragged = jax.block_until_ready(net_forward(x_ragged, params))
    assert out_ragged.shape == (1234, 1)
    assert jnp.allclose(out_ragged, reference_forward(x_ragged, params), atol=1e-5, rtol=1e-5)

    print("KERNEL_OK")
</pallas_src>

<mosaic_0001>
module attributes {stable_mosaic.version = 11 : i64} {
  func.func @affine_kernel(%arg0: i32, %arg1: memref<2xf32, #tpu.memory_space<smem>>, %arg2: memref<16x128xf32, #tpu.memory_space<vmem>>, %arg3: memref<16x128xf32, #tpu.memory_space<vmem>>) attributes {dimension_semantics = [#tpu.dimension_semantics<parallel>], iteration_bounds = array<i64: 1>, scalar_prefetch = 0 : i64, scratch_operands = 0 : i64, tpu.core_type = #tpu.core_type<tc>, window_params = [{transform_indices = @transform_0, window_bounds = array<i64: 2>}, {transform_indices = @transform_1, window_bounds = array<i64: 16, 128>}, {transform_indices = @transform_2, window_bounds = array<i64: 16, 128>}]} {
    %c0 = arith.constant 0 : index
    %0 = memref.load %arg1[%c0] : memref<2xf32, #tpu.memory_space<smem>>
    %c1 = arith.constant 1 : index
    %1 = memref.load %arg1[%c1] : memref<2xf32, #tpu.memory_space<smem>>
    %c0_0 = arith.constant 0 : index
    %c0_1 = arith.constant 0 : index
    %2 = vector.load %arg2[%c0_0, %c0_1] : memref<16x128xf32, #tpu.memory_space<vmem>>, vector<16x128xf32>
    %3 = vector.broadcast %0 : f32 to vector<16x128xf32>
    %4 = arith.mulf %2, %3 : vector<16x128xf32>
    %5 = vector.broadcast %1 : f32 to vector<16x128xf32>
    %6 = arith.addf %4, %5 : vector<16x128xf32>
    %c0_2 = arith.constant 0 : index
    %c0_3 = arith.constant 0 : index
    %7 = vector.load %arg3[%c0_2, %c0_3] : memref<16x128xf32, #tpu.memory_space<vmem>>, vector<16x128xf32>
    tpu.vector_store %arg3[%c0_2, %c0_3], %6 {strides = array<i32>} : memref<16x128xf32, #tpu.memory_space<vmem>>, vector<16x128xf32>,
    return
  }
  func.func @transform_0(%arg0: i32) -> i32 {
    %c0_i32 = arith.constant 0 : i32
    %c0_i32_0 = arith.constant 0 : i32
    return %c0_i32 : i32
  }
  func.func @transform_1(%arg0: i32) -> (i32, i32) {
    %c0_i32 = arith.constant 0 : i32
    %c0_i32_0 = arith.constant 0 : i32
    return %arg0, %c0_i32 : i32, i32
  }
  func.func @transform_2(%arg0: i32) -> (i32, i32) {
    %c0_i32 = arith.constant 0 : i32
    %c0_i32_0 = arith.constant 0 : i32
    return %arg0, %c0_i32 : i32, i32
  }
}

</mosaic_0001>

<bundles_post_ra>
// kernel: tpu_custom_call.1
= control target key start
LH: loop header
LB: loop body
LE: loop exit
PB: predicated region body
PF: predicated region fallthrough
CT: control target
= control target key end

     0   :  { %7 = vsyncpa [#allocation5], 0  ;;  %s195_s0 = inlined_call_operand.hbm [shape: f32[2], index: 0, kind: input, shape index: {}]   ;;  %s196_s1 = inlined_call_operand.hbm [shape: f32[16,128], index: 1, kind: input, shape index: {}]   ;;  %s197_s2 = inlined_call_operand.hbm [shape: f32[16,128], index: 2, kind: output, shape index: {}]  }
   0x1   :  { %8 = vsyncpa [#allocation3], 0 }
   0x2   :  { %9 = vsyncpa [#allocation4], 0  ;;  %s73_s11 = scalar_lea.hbm %s195_s0, 16 }
   0x3   :  { %p74_p0 = scmp.ne.s32.totalorder %s195_s0, %s73_s11  ;;  %p77_p1 = scmp.lt.u32.totalorder %s73_s11, %s195_s0 }
   0x5   :  { %p79_p2 = pnand %p77_p1, %p74_p0 }
   0x7   :  { %82 = shalt.err (!%p79_p2)
}
   0x8   :  { %s133_s16 = smov [#allocation2]   ;;  %s134_s19 = smov [#allocation6]  }
   0x9   :  { %17 = dma.hbm_to_smem %s195_s0, 16, %s133_s16, [#allocation5]  }
   0xa   :  { %s23_s20 = sshll.u32 %s134_s19, 4  ;;  %s83_s23 = scalar_lea.hbm %s196_s1, 256  ;;  %s24_s20 = int_to_ptr.vmem [resolvable:$true] %s23_s20 }
   0xb   :  { %p84_p3 = scmp.ne.s32.totalorder %s196_s1, %s83_s23  ;;  %p87_p4 = scmp.lt.u32.totalorder %s83_s23, %s196_s1 }
   0xd   :  { %p89_p5 = pnand %p87_p4, %p84_p3 }
   0xf   :  { %92 = shalt.err (!%p89_p5)
}
  0x10   :  { %s93_s28 = scalar_lea.vmem %s24_s20, 256  ;;  %p98_p7 = scmp.lt.s32.totalorder %s24_s20, %s24_s20 }
  0x11   :  { %p94_p6 = scmp.ne.s32.totalorder %s24_s20, %s93_s28  ;;  %p99_p8 = scmp.lt.s32.totalorder %s93_s28, %s93_s28 }
  0x13   :  { %p100_p9 = por %p99_p8, %p98_p7 }
  0x15   :  { %p101_p10 = pnand %p100_p9, %p94_p6 }
  0x17   :  { %104 = shalt.err (!%p101_p10)
}
  0x18   :  { %s135_s0 = smov 128   ;;  %s136_s29 = smov 8  }
  0x19   :  { %29 = dma.hbm_to_vmem [thread:$0]  %s196_s1, 256, %s24_s20, [#allocation3], %s135_s0, %s135_s0, %s136_s29  }
  0x1a   :  { %127 = dma.done.wait [#allocation5], 16  }
  0x1b   :  { %128 = vsyncadd [#allocation5], 4294967280 }
  0x1c   :  { %129 = dma.done.wait [#allocation3], 256  }
  0x1d   :  { %130 = vsyncadd [#allocation3], 4294967040 }
  0x1e   :  { %36 = sfence }
  0x1f   :  { %s37_s4 = sld [smem:[#allocation2]]  ;;  %s67_s5 = sld [smem:[#allocation2 + $0x1]]  ;;  %v39_v0 = vld [vmem:[#allocation6] sm:$0xff]  ;;  %v40_v1 = vld [vmem:[#allocation6 + $0x8] sm:$0xff] }
  0x20   :  { %s137_s6 = smov [#allocation7]  }
  0x21   :  { %s54_s7 = sshll.u32 %s137_s6, 4  ;;  %s55_s7 = int_to_ptr.vmem [resolvable:$true] %s54_s7 }
  0x22   :  { %s105_s1 = scalar_lea.vmem %s55_s7, 256  ;;  %p110_p12 = scmp.lt.s32.totalorder %s55_s7, %s55_s7 }
  0x23   :  { %p106_p11 = scmp.ne.s32.totalorder %s55_s7, %s105_s1  ;;  %p111_p13 = scmp.lt.s32.totalorder %s105_s1, %s105_s1 }
  0x25   :  { %v41_v2 = vstv %s37_s4  ;;  %v44_v3 = vstv %s67_s5  ;;  %p112_p0 = por %p111_p13, %p110_p12 }
  0x26   :  { %v42_v4 = vmul.f32 %v41_v2, %v39_v0  ;;  %v43_v5 = vmul.f32 %v41_v2, %v40_v1 }
  0x27   :  { %p113_p1 = pnand %p112_p0, %p106_p11 }
  0x28   :  { %v45_v6 = vadd.f32 %v44_v3, %v42_v4  ;;  %v46_v7 = vadd.f32 %v44_v3, %v43_v5 }
  0x2a   :  { %47 = vst [vmem:[#allocation7] sm:$0xff] %v45_v6  ;;  %48 = vst [vmem:[#allocation7 + $0x8] sm:$0xff] %v46_v7 }
  0x2b   :  { %116 = shalt.err (!%p113_p1)
}
  0x2c   :  { %s117_s10 = scalar_lea.hbm %s197_s2, 256 }
  0x2d   :  { %p118_p2 = scmp.ne.s32.totalorder %s197_s2, %s117_s10  ;;  %p121_p3 = scmp.lt.u32.totalorder %s117_s10, %s197_s2 }
  0x2f   :  { %p123_p4 = pnand %p121_p3, %p118_p2 }
  0x31   :  { %126 = shalt.err (!%p123_p4)
}
  0x32   :  { %60 = dma.vmem_to_hbm [thread:$0]  %s55_s7, 256, %s197_s2, [#allocation4], %s135_s0, %s135_s0, %s136_s29  }
  0x33   :  { %131 = dma.done.wait [#allocation4], 256  }
  0x34   :  { %132 = vsyncadd [#allocation4], 4294967040 }
  0x35   :  { %64 = vsyncpa [#allocation3], 1 }
  0x36   :  { %65 = vsyncpa [#allocation4], 1 }
  0x37   :  { %66 = vsyncpa [#allocation5], 1 }

</bundles_post_ra>
